<compile_context>
chip_gen: v5e
topology: v5e:2x2
jax: 0.10.0
libtpu: 0.0.40
codegen_flags: <defaults>
</compile_context>

<pallas_src>
import math
import functools

import jax
import jax.numpy as jnp
from jax import lax
from jax.experimental import pallas as pl
from jax.experimental.pallas import tpu as pltpu


def _sab_kernel(x_ref, wqkv_ref, wo_ref, bo_ref, o_ref, *,
                batch_per_block: int, seq_len: int, hidden: int,
                num_heads: int, head_dim: int):
    """One grid step: fused QKV projection over the whole (Bb*T, C) slab,
    per-(batch, head) softmax attention, output projection folded per head."""
    C = hidden
    T = seq_len
    Dh = head_dim

    x = x_ref[...]                                            # (Bb*T, C)
    wqkv = wqkv_ref[...]                                      # (C, 3C)
    wo = wo_ref[...]                                          # (C, C)
    bo = bo_ref[...]                                          # (1, C)

    # Single fused QKV projection (Q columns already scaled in the wrapper).
    qkv = jnp.dot(x, wqkv, preferred_element_type=jnp.float32)  # (Bb*T, 3C)

    # Static, fully-unrolled loops; every slice offset is compile-time known.
    for b in range(batch_per_block):
        r0 = b * T
        acc = jnp.zeros((T, C), jnp.float32)
        for h in range(num_heads):
            lo = h * Dh
            qh = lax.slice(qkv, (r0, lo), (r0 + T, lo + Dh))              # (T, Dh)
            kh = lax.slice(qkv, (r0, C + lo), (r0 + T, C + lo + Dh))      # (T, Dh)
            vh = lax.slice(qkv, (r0, 2 * C + lo), (r0 + T, 2 * C + lo + Dh))

            # Q . K^T contracting the last dim of both -> no K transpose.
            s = lax.dot_general(qh, kh, (((1,), (1,)), ((), ())),
                                preferred_element_type=jnp.float32)       # (T, T)

            # Softmax over the last axis (max-subtracted, matches torch).
            s = s - jnp.max(s, axis=-1, keepdims=True)
            p = jnp.exp(s)
            denom = jnp.sum(p, axis=-1, keepdims=True)
            p = p * pl.reciprocal(denom, approx=True)
            # dropout_rate == 0.0 -> drop_weights is identity.

            yh = jnp.dot(p, vh, preferred_element_type=jnp.float32)       # (T, Dh)
            # Fold this head's contribution straight into the output
            # projection (replaces the old per-head narrow VMEM stores).
            acc = acc + jnp.dot(yh, wo[lo:lo + Dh, :],
                                preferred_element_type=jnp.float32)       # (T, C)

        # out_proj bias; drop_output is identity.  Single lane-dense store.
        o_ref[r0:r0 + T, :] = (acc + bo).astype(o_ref.dtype)


@functools.partial(jax.jit, static_argnames=("num_heads", "num_batch_blocks"))
def sab_forward(x, wq_t, wk_t, wv_t, wo_t, bo, *, num_heads: int,
                num_batch_blocks: int = 1):
    """x: (B, T, C); w*_t: (C, C) already transposed (in_features, out_features);
    bo: (1, C).

    num_batch_blocks=1 -> single grid step (best on single-TC v5e/v6e).
    num_batch_blocks=2 -> 2-way "parallel" batch axis for v7x's two TCs.
    """
    B, T, C = x.shape
    assert C % num_heads == 0
    assert B % num_batch_blocks == 0
    Dh = C // num_heads
    Bb = B // num_batch_blocks
    rows = Bb * T
    scale = 1.0 / math.sqrt(Dh)

    # Fuse the three projection weights into one (C, 3C) matrix and fold the
    # attention scale into the Q columns (free in the wrapper).
    wqkv = jnp.concatenate([wq_t * scale, wk_t, wv_t], axis=1)

    # Fold batch into the projection M dimension.
    xf = x.reshape(B * T, C)

    kernel = functools.partial(
        _sab_kernel, batch_per_block=Bb, seq_len=T, hidden=C,
        num_heads=num_heads, head_dim=Dh)

    grid_spec = pltpu.PrefetchScalarGridSpec(
        num_scalar_prefetch=0,
        grid=(num_batch_blocks,),
        in_specs=[
            pl.BlockSpec((rows, C), lambda i: (i, 0)),      # x slab (Bb*T, C)
            pl.BlockSpec((C, 3 * C), lambda i: (0, 0)),     # fused Wqkv^T
            pl.BlockSpec((C, C), lambda i: (0, 0)),         # Wo^T
            pl.BlockSpec((1, C), lambda i: (0, 0)),         # out_proj bias
        ],
        out_specs=pl.BlockSpec((rows, C), lambda i: (i, 0)),
    )

    out_flat = pl.pallas_call(
        kernel,
        out_shape=jax.ShapeDtypeStruct((B * T, C), x.dtype),
        grid_spec=grid_spec,
        compiler_params=pltpu.CompilerParams(
            dimension_semantics=("parallel",)),
    )(xf, wqkv, wo_t, bo)

    return out_flat.reshape(B, T, C)


def sab_reference(x, wq_t, wk_t, wv_t, wo_t, bo, *, num_heads: int):
    """Plain-JAX reference mirroring the PyTorch forward exactly."""
    B, T, C = x.shape
    Dh = C // num_heads
    scale = 1.0 / math.sqrt(Dh)

    q = x @ wq_t
    k = x @ wk_t
    v = x @ wv_t
    q = q.reshape(B, T, num_heads, Dh).transpose(0, 2, 1, 3) * scale
    k = k.reshape(B, T, num_heads, Dh).transpose(0, 2, 1, 3)
    v = v.reshape(B, T, num_heads, Dh).transpose(0, 2, 1, 3)
    scores = q @ jnp.swapaxes(k, -2, -1)
    probs = jax.nn.softmax(scores, axis=-1)
    y = probs @ v
    y = y.transpose(0, 2, 1, 3).reshape(B, T, C)
    return y @ wo_t + bo


if __name__ == "__main__":
    B, T, C = 2, 8, 32
    num_heads = 4

    key = jax.random.PRNGKey(0)
    kx, kq, kk, kv, ko, kb = jax.random.split(key, 6)

    # Deterministic parameter init (uniform ~ PyTorch Linear default range).
    bound = 1.0 / math.sqrt(C)
    x = jax.random.normal(kx, (B, T, C), dtype=jnp.float32)
    # Stored already transposed: (in_features, out_features).
    wq_t = jax.random.uniform(kq, (C, C), jnp.float32, -bound, bound)
    wk_t = jax.random.uniform(kk, (C, C), jnp.float32, -bound, bound)
    wv_t = jax.random.uniform(kv, (C, C), jnp.float32, -bound, bound)
    wo_t = jax.random.uniform(ko, (C, C), jnp.float32, -bound, bound)
    bo = jax.random.uniform(kb, (1, C), jnp.float32, -bound, bound)

    ref = sab_reference(x, wq_t, wk_t, wv_t, wo_t, bo, num_heads=num_heads)

    # Default path: collapsed grid (v5e/v6e-friendly).
    out = sab_forward(x, wq_t, wk_t, wv_t, wo_t, bo, num_heads=num_heads,
                      num_batch_blocks=1)
    out = jax.block_until_ready(out)
    assert out.shape == (B, T, C)
    assert jnp.allclose(out, ref, atol=2e-3, rtol=2e-3), "mismatch (1 block)"

    # v7x path: 2-way parallel batch axis (one block per TensorCore).
    out2 = sab_forward(x, wq_t, wk_t, wv_t, wo_t, bo, num_heads=num_heads,
                       num_batch_blocks=2)
    out2 = jax.block_until_ready(out2)
    assert jnp.allclose(out2, ref, atol=2e-3, rtol=2e-3), "mismatch (2 blocks)"

    # TODO(synk): causal masking, dropout_rate>0, and cross-attention
    # (context) paths not implemented (module defaults elide them).
    print("KERNEL_OK")
</pallas_src>

<mosaic_0001>
module attributes {stable_mosaic.version = 11 : i64} {
  func.func @_sab_kernel(%arg0: i32, %arg1: memref<16x32xf32, #tpu.memory_space<vmem>>, %arg2: memref<32x96xf32, #tpu.memory_space<vmem>>, %arg3: memref<32x32xf32, #tpu.memory_space<vmem>>, %arg4: memref<1x32xf32, #tpu.memory_space<vmem>>, %arg5: memref<16x32xf32, #tpu.memory_space<vmem>>) attributes {dimension_semantics = [#tpu.dimension_semantics<parallel>], iteration_bounds = array<i64: 1>, scalar_prefetch = 0 : i64, scratch_operands = 0 : i64, tpu.core_type = #tpu.core_type<tc>, window_params = [{transform_indices = @transform_0, window_bounds = array<i64: 16, 32>}, {pipeline_mode = #tpu.pipeline_mode<synchronous>, transform_indices = @transform_1, window_bounds = array<i64: 32, 96>}, {pipeline_mode = #tpu.pipeline_mode<synchronous>, transform_indices = @transform_2, window_bounds = array<i64: 32, 32>}, {pipeline_mode = #tpu.pipeline_mode<synchronous>, transform_indices = @transform_3, window_bounds = array<i64: 1, 32>}, {transform_indices = @transform_4, window_bounds = array<i64: 16, 32>}]} {
    %c0 = arith.constant 0 : index
    %c0_0 = arith.constant 0 : index
    %0 = vector.load %arg1[%c0, %c0_0] : memref<16x32xf32, #tpu.memory_space<vmem>>, vector<16x32xf32>
    %c0_1 = arith.constant 0 : index
    %c0_2 = arith.constant 0 : index
    %1 = vector.load %arg2[%c0_1, %c0_2] : memref<32x96xf32, #tpu.memory_space<vmem>>, vector<32x96xf32>
    %c0_3 = arith.constant 0 : index
    %c0_4 = arith.constant 0 : index
    %2 = vector.load %arg3[%c0_3, %c0_4] : memref<32x32xf32, #tpu.memory_space<vmem>>, vector<32x32xf32>
    %c0_5 = arith.constant 0 : index
    %c0_6 = arith.constant 0 : index
    %3 = vector.load %arg4[%c0_5, %c0_6] : memref<1x32xf32, #tpu.memory_space<vmem>>, vector<1x32xf32>
    %cst = arith.constant dense<0.000000e+00> : vector<16x96xf32>
    %4 = tpu.matmul %0, %1, %cst {dimension_numbers = #tpu.dot_dimension_numbers<[1], [0], [0], [1], [0, 0, 1, 1], [], []>} : vector<16x32xf32>, vector<32x96xf32>, vector<16x96xf32> -> vector<16x96xf32>
    %cst_7 = arith.constant 0.000000e+00 : f32
    %5 = vector.broadcast %cst_7 : f32 to vector<8x32xf32>
    %6 = vector.extract_strided_slice %4 {offsets = [0, 0], sizes = [8, 8], strides = [1, 1]} : vector<16x96xf32> to vector<8x8xf32>
    %7 = vector.extract_strided_slice %4 {offsets = [0, 32], sizes = [8, 8], strides = [1, 1]} : vector<16x96xf32> to vector<8x8xf32>
    %8 = vector.extract_strided_slice %4 {offsets = [0, 64], sizes = [8, 8], strides = [1, 1]} : vector<16x96xf32> to vector<8x8xf32>
    %cst_8 = arith.constant dense<0.000000e+00> : vector<8x8xf32>
    %9 = tpu.matmul %6, %7, %cst_8 {dimension_numbers = #tpu.dot_dimension_numbers<[1], [1], [0], [0], [0, 0, 1, 0], [], []>} : vector<8x8xf32>, vector<8x8xf32>, vector<8x8xf32> -> vector<8x8xf32>
    %cst_9 = arith.constant dense<0xFF800000> : vector<8xf32>
    %10 = vector.multi_reduction <maximumf>, %9, %cst_9 [1] : vector<8x8xf32> to vector<8xf32>
    %11 = vector.shape_cast %10 : vector<8xf32> to vector<8x1xf32>
    %12 = vector.broadcast %11 : vector<8x1xf32> to vector<8x8xf32>
    %13 = arith.subf %9, %12 : vector<8x8xf32>
    %14 = math.exp %13 : vector<8x8xf32>
    %cst_10 = arith.constant dense<0.000000e+00> : vector<8xf32>
    %15 = vector.multi_reduction <add>, %14, %cst_10 [1] : vector<8x8xf32> to vector<8xf32>
    %16 = vector.shape_cast %15 : vector<8xf32> to vector<8x1xf32>
    %17 = tpu.reciprocal %16 {approx = true} : vector<8x1xf32> -> vector<8x1xf32>
    %18 = vector.broadcast %17 : vector<8x1xf32> to vector<8x8xf32>
    %19 = arith.mulf %14, %18 : vector<8x8xf32>
    %cst_11 = arith.constant dense<0.000000e+00> : vector<8x8xf32>
    %20 = tpu.matmul %19, %8, %cst_11 {dimension_numbers = #tpu.dot_dimension_numbers<[1], [0], [0], [1], [0, 0, 1, 1], [], []>} : vector<8x8xf32>, vector<8x8xf32>, vector<8x8xf32> -> vector<8x8xf32>
    %21 = vector.extract_strided_slice %2 {offsets = [0, 0], sizes = [8, 32], strides = [1, 1]} : vector<32x32xf32> to vector<8x32xf32>
    %cst_12 = arith.constant dense<0.000000e+00> : vector<8x32xf32>
    %22 = tpu.matmul %20, %21, %cst_12 {dimension_numbers = #tpu.dot_dimension_numbers<[1], [0], [0], [1], [0, 0, 1, 1], [], []>} : vector<8x8xf32>, vector<8x32xf32>, vector<8x32xf32> -> vector<8x32xf32>
    %23 = arith.addf %5, %22 : vector<8x32xf32>
    %24 = vector.extract_strided_slice %4 {offsets = [0, 8], sizes = [8, 8], strides = [1, 1]} : vector<16x96xf32> to vector<8x8xf32>
    %25 = vector.extract_strided_slice %4 {offsets = [0, 40], sizes = [8, 8], strides = [1, 1]} : vector<16x96xf32> to vector<8x8xf32>
    %26 = vector.extract_strided_slice %4 {offsets = [0, 72], sizes = [8, 8], strides = [1, 1]} : vector<16x96xf32> to vector<8x8xf32>
    %cst_13 = arith.constant dense<0.000000e+00> : vector<8x8xf32>
    %27 = tpu.matmul %24, %25, %cst_13 {dimension_numbers = #tpu.dot_dimension_numbers<[1], [1], [0], [0], [0, 0, 1, 0], [], []>} : vector<8x8xf32>, vector<8x8xf32>, vector<8x8xf32> -> vector<8x8xf32>
    %cst_14 = arith.constant dense<0xFF800000> : vector<8xf32>
    %28 = vector.multi_reduction <maximumf>, %27, %cst_14 [1] : vector<8x8xf32> to vector<8xf32>
    %29 = vector.shape_cast %28 : vector<8xf32> to vector<8x1xf32>
    %30 = vector.broadcast %29 : vector<8x1xf32> to vector<8x8xf32>
    %31 = arith.subf %27, %30 : vector<8x8xf32>
    %32 = math.exp %31 : vector<8x8xf32>
    %cst_15 = arith.constant dense<0.000000e+00> : vector<8xf32>
    %33 = vector.multi_reduction <add>, %32, %cst_15 [1] : vector<8x8xf32> to vector<8xf32>
    %34 = vector.shape_cast %33 : vector<8xf32> to vector<8x1xf32>
    %35 = tpu.reciprocal %34 {approx = true} : vector<8x1xf32> -> vector<8x1xf32>
    %36 = vector.broadcast %35 : vector<8x1xf32> to vector<8x8xf32>
    %37 = arith.mulf %32, %36 : vector<8x8xf32>
    %cst_16 = arith.constant dense<0.000000e+00> : vector<8x8xf32>
    %38 = tpu.matmul %37, %26, %cst_16 {dimension_numbers = #tpu.dot_dimension_numbers<[1], [0], [0], [1], [0, 0, 1, 1], [], []>} : vector<8x8xf32>, vector<8x8xf32>, vector<8x8xf32> -> vector<8x8xf32>
    %39 = vector.extract_strided_slice %2 {offsets = [8, 0], sizes = [8, 32], strides = [1, 1]} : vector<32x32xf32> to vector<8x32xf32>
    %cst_17 = arith.constant dense<0.000000e+00> : vector<8x32xf32>
    %40 = tpu.matmul %38, %39, %cst_17 {dimension_numbers = #tpu.dot_dimension_numbers<[1], [0], [0], [1], [0, 0, 1, 1], [], []>} : vector<8x8xf32>, vector<8x32xf32>, vector<8x32xf32> -> vector<8x32xf32>
    %41 = arith.addf %23, %40 : vector<8x32xf32>
    %42 = vector.extract_strided_slice %4 {offsets = [0, 16], sizes = [8, 8], strides = [1, 1]} : vector<16x96xf32> to vector<8x8xf32>
    %43 = vector.extract_strided_slice %4 {offsets = [0, 48], sizes = [8, 8], strides = [1, 1]} : vector<16x96xf32> to vector<8x8xf32>
    %44 = vector.extract_strided_slice %4 {offsets = [0, 80], sizes = [8, 8], strides = [1, 1]} : vector<16x96xf32> to vector<8x8xf32>
    %cst_18 = arith.constant dense<0.000000e+00> : vector<8x8xf32>
    %45 = tpu.matmul %42, %43, %cst_18 {dimension_numbers = #tpu.dot_dimension_numbers<[1], [1], [0], [0], [0, 0, 1, 0], [], []>} : vector<8x8xf32>, vector<8x8xf32>, vector<8x8xf32> -> vector<8x8xf32>
    %cst_19 = arith.constant dense<0xFF800000> : vector<8xf32>
    %46 = vector.multi_reduction <maximumf>, %45, %cst_19 [1] : vector<8x8xf32> to vector<8xf32>
    %47 = vector.shape_cast %46 : vector<8xf32> to vector<8x1xf32>
    %48 = vector.broadcast %47 : vector<8x1xf32> to vector<8x8xf32>
    %49 = arith.subf %45, %48 : vector<8x8xf32>
    %50 = math.exp %49 : vector<8x8xf32>
    %cst_20 = arith.constant dense<0.000000e+00> : vector<8xf32>
    %51 = vector.multi_reduction <add>, %50, %cst_20 [1] : vector<8x8xf32> to vector<8xf32>
    %52 = vector.shape_cast %51 : vector<8xf32> to vector<8x1xf32>
    %53 = tpu.reciprocal %52 {approx = true} : vector<8x1xf32> -> vector<8x1xf32>
    %54 = vector.broadcast %53 : vector<8x1xf32> to vector<8x8xf32>
    %55 = arith.mulf %50, %54 : vector<8x8xf32>
    %cst_21 = arith.constant dense<0.000000e+00> : vector<8x8xf32>
    %56 = tpu.matmul %55, %44, %cst_21 {dimension_numbers = #tpu.dot_dimension_numbers<[1], [0], [0], [1], [0, 0, 1, 1], [], []>} : vector<8x8xf32>, vector<8x8xf32>, vector<8x8xf32> -> vector<8x8xf32>
    %57 = vector.extract_strided_slice %2 {offsets = [16, 0], sizes = [8, 32], strides = [1, 1]} : vector<32x32xf32> to vector<8x32xf32>
    %cst_22 = arith.constant dense<0.000000e+00> : vector<8x32xf32>
    %58 = tpu.matmul %56, %57, %cst_22 {dimension_numbers = #tpu.dot_dimension_numbers<[1], [0], [0], [1], [0, 0, 1, 1], [], []>} : vector<8x8xf32>, vector<8x32xf32>, vector<8x32xf32> -> vector<8x32xf32>
    %59 = arith.addf %41, %58 : vector<8x32xf32>
    %60 = vector.extract_strided_slice %4 {offsets = [0, 24], sizes = [8, 8], strides = [1, 1]} : vector<16x96xf32> to vector<8x8xf32>
    %61 = vector.extract_strided_slice %4 {offsets = [0, 56], sizes = [8, 8], strides = [1, 1]} : vector<16x96xf32> to vector<8x8xf32>
    %62 = vector.extract_strided_slice %4 {offsets = [0, 88], sizes = [8, 8], strides = [1, 1]} : vector<16x96xf32> to vector<8x8xf32>
    %cst_23 = arith.constant dense<0.000000e+00> : vector<8x8xf32>
    %63 = tpu.matmul %60, %61, %cst_23 {dimension_numbers = #tpu.dot_dimension_numbers<[1], [1], [0], [0], [0, 0, 1, 0], [], []>} : vector<8x8xf32>, vector<8x8xf32>, vector<8x8xf32> -> vector<8x8xf32>
    %cst_24 = arith.constant dense<0xFF800000> : vector<8xf32>
    %64 = vector.multi_reduction <maximumf>, %63, %cst_24 [1] : vector<8x8xf32> to vector<8xf32>
    %65 = vector.shape_cast %64 : vector<8xf32> to vector<8x1xf32>
    %66 = vector.broadcast %65 : vector<8x1xf32> to vector<8x8xf32>
    %67 = arith.subf %63, %66 : vector<8x8xf32>
    %68 = math.exp %67 : vector<8x8xf32>
    %cst_25 = arith.constant dense<0.000000e+00> : vector<8xf32>
    %69 = vector.multi_reduction <add>, %68, %cst_25 [1] : vector<8x8xf32> to vector<8xf32>
    %70 = vector.shape_cast %69 : vector<8xf32> to vector<8x1xf32>
    %71 = tpu.reciprocal %70 {approx = true} : vector<8x1xf32> -> vector<8x1xf32>
    %72 = vector.broadcast %71 : vector<8x1xf32> to vector<8x8xf32>
    %73 = arith.mulf %68, %72 : vector<8x8xf32>
    %cst_26 = arith.constant dense<0.000000e+00> : vector<8x8xf32>
    %74 = tpu.matmul %73, %62, %cst_26 {dimension_numbers = #tpu.dot_dimension_numbers<[1], [0], [0], [1], [0, 0, 1, 1], [], []>} : vector<8x8xf32>, vector<8x8xf32>, vector<8x8xf32> -> vector<8x8xf32>
    %75 = vector.extract_strided_slice %2 {offsets = [24, 0], sizes = [8, 32], strides = [1, 1]} : vector<32x32xf32> to vector<8x32xf32>
    %cst_27 = arith.constant dense<0.000000e+00> : vector<8x32xf32>
    %76 = tpu.matmul %74, %75, %cst_27 {dimension_numbers = #tpu.dot_dimension_numbers<[1], [0], [0], [1], [0, 0, 1, 1], [], []>} : vector<8x8xf32>, vector<8x32xf32>, vector<8x32xf32> -> vector<8x32xf32>
    %77 = arith.addf %59, %76 : vector<8x32xf32>
    %78 = vector.broadcast %3 : vector<1x32xf32> to vector<8x32xf32>
    %79 = arith.addf %77, %78 : vector<8x32xf32>
    %c0_28 = arith.constant 0 : index
    %c0_29 = arith.constant 0 : index
    %80 = vector.load %arg5[%c0_28, %c0_29] : memref<16x32xf32, #tpu.memory_space<vmem>>, vector<8x32xf32>
    tpu.vector_store %arg5[%c0_28, %c0_29], %79 {strides = array<i32>} : memref<16x32xf32, #tpu.memory_space<vmem>>, vector<8x32xf32>,
    %cst_30 = arith.constant 0.000000e+00 : f32
    %81 = vector.broadcast %cst_30 : f32 to vector<8x32xf32>
    %82 = vector.extract_strided_slice %4 {offsets = [8, 0], sizes = [8, 8], strides = [1, 1]} : vector<16x96xf32> to vector<8x8xf32>
    %83 = vector.extract_strided_slice %4 {offsets = [8, 32], sizes = [8, 8], strides = [1, 1]} : vector<16x96xf32> to vector<8x8xf32>
    %84 = vector.extract_strided_slice %4 {offsets = [8, 64], sizes = [8, 8], strides = [1, 1]} : vector<16x96xf32> to vector<8x8xf32>
    %cst_31 = arith.constant dense<0.000000e+00> : vector<8x8xf32>
    %85 = tpu.matmul %82, %83, %cst_31 {dimension_numbers = #tpu.dot_dimension_numbers<[1], [1], [0], [0], [0, 0, 1, 0], [], []>} : vector<8x8xf32>, vector<8x8xf32>, vector<8x8xf32> -> vector<8x8xf32>
    %cst_32 = arith.constant dense<0xFF800000> : vector<8xf32>
    %86 = vector.multi_reduction <maximumf>, %85, %cst_32 [1] : vector<8x8xf32> to vector<8xf32>
    %87 = vector.shape_cast %86 : vector<8xf32> to vector<8x1xf32>
    %88 = vector.broadcast %87 : vector<8x1xf32> to vector<8x8xf32>
    %89 = arith.subf %85, %88 : vector<8x8xf32>
    %90 = math.exp %89 : vector<8x8xf32>
    %cst_33 = arith.constant dense<0.000000e+00> : vector<8xf32>
    %91 = vector.multi_reduction <add>, %90, %cst_33 [1] : vector<8x8xf32> to vector<8xf32>
    %92 = vector.shape_cast %91 : vector<8xf32> to vector<8x1xf32>
    %93 = tpu.reciprocal %92 {approx = true} : vector<8x1xf32> -> vector<8x1xf32>
    %94 = vector.broadcast %93 : vector<8x1xf32> to vector<8x8xf32>
    %95 = arith.mulf %90, %94 : vector<8x8xf32>
    %cst_34 = arith.constant dense<0.000000e+00> : vector<8x8xf32>
    %96 = tpu.matmul %95, %84, %cst_34 {dimension_numbers = #tpu.dot_dimension_numbers<[1], [0], [0], [1], [0, 0, 1, 1], [], []>} : vector<8x8xf32>, vector<8x8xf32>, vector<8x8xf32> -> vector<8x8xf32>
    %97 = vector.extract_strided_slice %2 {offsets = [0, 0], sizes = [8, 32], strides = [1, 1]} : vector<32x32xf32> to vector<8x32xf32>
    %cst_35 = arith.constant dense<0.000000e+00> : vector<8x32xf32>
    %98 = tpu.matmul %96, %97, %cst_35 {dimension_numbers = #tpu.dot_dimension_numbers<[1], [0], [0], [1], [0, 0, 1, 1], [], []>} : vector<8x8xf32>, vector<8x32xf32>, vector<8x32xf32> -> vector<8x32xf32>
    %99 = arith.addf %81, %98 : vector<8x32xf32>
    %100 = vector.extract_strided_slice %4 {offsets = [8, 8], sizes = [8, 8], strides = [1, 1]} : vector<16x96xf32> to vector<8x8xf32>
    %101 = vector.extract_strided_slice %4 {offsets = [8, 40], sizes = [8, 8], strides = [1, 1]} : vector<16x96xf32> to vector<8x8xf32>
    %102 = vector.extract_strided_slice %4 {offsets = [8, 72], sizes = [8, 8], strides = [1, 1]} : vector<16x96xf32> to vector<8x8xf32>
    %cst_36 = arith.constant dense<0.000000e+00> : vector<8x8xf32>
    %103 = tpu.matmul %100, %101, %cst_36 {dimension_numbers = #tpu.dot_dimension_numbers<[1], [1], [0], [0], [0, 0, 1, 0], [], []>} : vector<8x8xf32>, vector<8x8xf32>, vector<8x8xf32> -> vector<8x8xf32>
    %cst_37 = arith.constant dense<0xFF800000> : vector<8xf32>
    %104 = vector.multi_reduction <maximumf>, %103, %cst_37 [1] : vector<8x8xf32> to vector<8xf32>
    %105 = vector.shape_cast %104 : vector<8xf32> to vector<8x1xf32>
    %106 = vector.broadcast %105 : vector<8x1xf32> to vector<8x8xf32>
    %107 = arith.subf %103, %106 : vector<8x8xf32>
    %108 = math.exp %107 : vector<8x8xf32>
    %cst_38 = arith.constant dense<0.000000e+00> : vector<8xf32>
    %109 = vector.multi_reduction <add>, %108, %cst_38 [1] : vector<8x8xf32> to vector<8xf32>
    %110 = vector.shape_cast %109 : vector<8xf32> to vector<8x1xf32>
    %111 = tpu.reciprocal %110 {approx = true} : vector<8x1xf32> -> vector<8x1xf32>
    %112 = vector.broadcast %111 : vector<8x1xf32> to vector<8x8xf32>
    %113 = arith.mulf %108, %112 : vector<8x8xf32>
    %cst_39 = arith.constant dense<0.000000e+00> : vector<8x8xf32>
    %114 = tpu.matmul %113, %102, %cst_39 {dimension_numbers = #tpu.dot_dimension_numbers<[1], [0], [0], [1], [0, 0, 1, 1], [], []>} : vector<8x8xf32>, vector<8x8xf32>, vector<8x8xf32> -> vector<8x8xf32>
    %115 = vector.extract_strided_slice %2 {offsets = [8, 0], sizes = [8, 32], strides = [1, 1]} : vector<32x32xf32> to vector<8x32xf32>
    %cst_40 = arith.constant dense<0.000000e+00> : vector<8x32xf32>
    %116 = tpu.matmul %114, %115, %cst_40 {dimension_numbers = #tpu.dot_dimension_numbers<[1], [0], [0], [1], [0, 0, 1, 1], [], []>} : vector<8x8xf32>, vector<8x32xf32>, vector<8x32xf32> -> vector<8x32xf32>
    %117 = arith.addf %99, %116 : vector<8x32xf32>
    %118 = vector.extract_strided_slice %4 {offsets = [8, 16], sizes = [8, 8], strides = [1, 1]} : vector<16x96xf32> to vector<8x8xf32>
    %119 = vector.extract_strided_slice %4 {offsets = [8, 48], sizes = [8, 8], strides = [1, 1]} : vector<16x96xf32> to vector<8x8xf32>
    %120 = vector.extract_strided_slice %4 {offsets = [8, 80], sizes = [8, 8], strides = [1, 1]} : vector<16x96xf32> to vector<8x8xf32>
    %cst_41 = arith.constant dense<0.000000e+00> : vector<8x8xf32>
    %121 = tpu.matmul %118, %119, %cst_41 {dimension_numbers = #tpu.dot_dimension_numbers<[1], [1], [0], [0], [0, 0, 1, 0], [], []>} : vector<8x8xf32>, vector<8x8xf32>, vector<8x8xf32> -> vector<8x8xf32>
    %cst_42 = arith.constant dense<0xFF800000> : vector<8xf32>
    %122 = vector.multi_reduction <maximumf>, %121, %cst_42 [1] : vector<8x8xf32> to vector<8xf32>
    %123 = vector.shape_cast %122 : vector<8xf32> to vector<8x1xf32>
    %124 = vector.broadcast %123 : vector<8x1xf32> to vector<8x8xf32>
    %125 = arith.subf %121, %124 : vector<8x8xf32>
    %126 = math.exp %125 : vector<8x8xf32>
    %cst_43 = arith.constant dense<0.000000e+00> : vector<8xf32>
    %127 = vector.multi_reduction <add>, %126, %cst_43 [1] : vector<8x8xf32> to vector<8xf32>
    %128 = vector.shape_cast %127 : vector<8xf32> to vector<8x1xf32>
    %129 = tpu.reciprocal %128 {approx = true} : vector<8x1xf32> -> vector<8x1xf32>
    %130 = vector.broadcast %129 : vector<8x1xf32> to vector<8x8xf32>
    %131 = arith.mulf %126, %130 : vector<8x8xf32>
    %cst_44 = arith.constant dense<0.000000e+00> : vector<8x8xf32>
    %132 = tpu.matmul %131, %120, %cst_44 {dimension_numbers = #tpu.dot_dimension_numbers<[1], [0], [0], [1], [0, 0, 1, 1], [], []>} : vector<8x8xf32>, vector<8x8xf32>, vector<8x8xf32> -> vector<8x8xf32>
    %133 = vector.extract_strided_slice %2 {offsets = [16, 0], sizes = [8, 32], strides = [1, 1]} : vector<32x32xf32> to vector<8x32xf32>
    %cst_45 = arith.constant dense<0.000000e+00> : vector<8x32xf32>
    %134 = tpu.matmul %132, %133, %cst_45 {dimension_numbers = #tpu.dot_dimension_numbers<[1], [0], [0], [1], [0, 0, 1, 1], [], []>} : vector<8x8xf32>, vector<8x32xf32>, vector<8x32xf32> -> vector<8x32xf32>
    %135 = arith.addf %117, %134 : vector<8x32xf32>
    %136 = vector.extract_strided_slice %4 {offsets = [8, 24], sizes = [8, 8], strides = [1, 1]} : vector<16x96xf32> to vector<8x8xf32>
    %137 = vector.extract_strided_slice %4 {offsets = [8, 56], sizes = [8, 8], strides = [1, 1]} : vector<16x96xf32> to vector<8x8xf32>
    %138 = vector.extract_strided_slice %4 {offsets = [8, 88], sizes = [8, 8], strides = [1, 1]} : vector<16x96xf32> to vector<8x8xf32>
    %cst_46 = arith.constant dense<0.000000e+00> : vector<8x8xf32>
    %139 = tpu.matmul %136, %137, %cst_46 {dimension_numbers = #tpu.dot_dimension_numbers<[1], [1], [0], [0], [0, 0, 1, 0], [], []>} : vector<8x8xf32>, vector<8x8xf32>, vector<8x8xf32> -> vector<8x8xf32>
    %cst_47 = arith.constant dense<0xFF800000> : vector<8xf32>
    %140 = vector.multi_reduction <maximumf>, %139, %cst_47 [1] : vector<8x8xf32> to vector<8xf32>
    %141 = vector.shape_cast %140 : vector<8xf32> to vector<8x1xf32>
    %142 = vector.broadcast %141 : vector<8x1xf32> to vector<8x8xf32>
    %143 = arith.subf %139, %142 : vector<8x8xf32>
    %144 = math.exp %143 : vector<8x8xf32>
    %cst_48 = arith.constant dense<0.000000e+00> : vector<8xf32>
    %145 = vector.multi_reduction <add>, %144, %cst_48 [1] : vector<8x8xf32> to vector<8xf32>
    %146 = vector.shape_cast %145 : vector<8xf32> to vector<8x1xf32>
    %147 = tpu.reciprocal %146 {approx = true} : vector<8x1xf32> -> vector<8x1xf32>
    %148 = vector.broadcast %147 : vector<8x1xf32> to vector<8x8xf32>
    %149 = arith.mulf %144, %148 : vector<8x8xf32>
    %cst_49 = arith.constant dense<0.000000e+00> : vector<8x8xf32>
    %150 = tpu.matmul %149, %138, %cst_49 {dimension_numbers = #tpu.dot_dimension_numbers<[1], [0], [0], [1], [0, 0, 1, 1], [], []>} : vector<8x8xf32>, vector<8x8xf32>, vector<8x8xf32> -> vector<8x8xf32>
    %151 = vector.extract_strided_slice %2 {offsets = [24, 0], sizes = [8, 32], strides = [1, 1]} : vector<32x32xf32> to vector<8x32xf32>
    %cst_50 = arith.constant dense<0.000000e+00> : vector<8x32xf32>
    %152 = tpu.matmul %150, %151, %cst_50 {dimension_numbers = #tpu.dot_dimension_numbers<[1], [0], [0], [1], [0, 0, 1, 1], [], []>} : vector<8x8xf32>, vector<8x32xf32>, vector<8x32xf32> -> vector<8x32xf32>
    %153 = arith.addf %135, %152 : vector<8x32xf32>
    %154 = vector.broadcast %3 : vector<1x32xf32> to vector<8x32xf32>
    %155 = arith.addf %153, %154 : vector<8x32xf32>
    %c8 = arith.constant 8 : index
    %c0_51 = arith.constant 0 : index
    %156 = vector.load %arg5[%c8, %c0_51] : memref<16x32xf32, #tpu.memory_space<vmem>>, vector<8x32xf32>
    tpu.vector_store %arg5[%c8, %c0_51], %155 {strides = array<i32>} : memref<16x32xf32, #tpu.memory_space<vmem>>, vector<8x32xf32>,
    return
  }
  func.func @transform_0(%arg0: i32) -> (i32, i32) {
    %c0_i32 = arith.constant 0 : i32
    %c0_i32_0 = arith.constant 0 : i32
    return %arg0, %c0_i32 : i32, i32
  }
  func.func @transform_1(%arg0: i32) -> (i32, i32) {
    %c0_i32 = arith.constant 0 : i32
    %c0_i32_0 = arith.constant 0 : i32
    %c0_i32_1 = arith.constant 0 : i32
    return %c0_i32, %c0_i32_0 : i32, i32
  }
  func.func @transform_2(%arg0: i32) -> (i32, i32) {
    %c0_i32 = arith.constant 0 : i32
    %c0_i32_0 = arith.constant 0 : i32
    %c0_i32_1 = arith.constant 0 : i32
    return %c0_i32, %c0_i32_0 : i32, i32
  }
  func.func @transform_3(%arg0: i32) -> (i32, i32) {
    %c0_i32 = arith.constant 0 : i32
    %c0_i32_0 = arith.constant 0 : i32
    %c0_i32_1 = arith.constant 0 : i32
    return %c0_i32, %c0_i32_0 : i32, i32
  }
  func.func @transform_4(%arg0: i32) -> (i32, i32) {
    %c0_i32 = arith.constant 0 : i32
    %c0_i32_0 = arith.constant 0 : i32
    return %arg0, %c0_i32 : i32, i32
  }
}

</mosaic_0001>

<bundles_post_ra>
// kernel: sab_forward.1
= control target key start
LH: loop header
LB: loop body
LE: loop exit
PB: predicated region body
PF: predicated region fallthrough
CT: control target
= control target key end

     0   :  { %s1092_s0 = inlined_call_operand.vmem [shape: f32[16,32], index: 0, kind: input, shape index: {}]   ;;  %s1093_s1 = inlined_call_operand.vmem [shape: f32[32,96], index: 1, kind: input, shape index: {}]   ;;  %s1094_s2 = inlined_call_operand.vmem [shape: f32[32,32], index: 2, kind: input, shape index: {}]   ;;  %s1095_s3 = inlined_call_operand.vmem [shape: f32[1,32], index: 3, kind: input, shape index: {}]   ;;  %s1096_s4 = inlined_call_operand.hbm [shape: f32[16,32], index: 4, kind: output, shape index: {}]  }
   0x1   :  { %v23_v0 = vld [vmem:[%s1093_s1 + $0x18] sm:$0xff]  ;;  %v22_v1 = vld [vmem:[%s1093_s1 + $0x10] sm:$0xff]  ;;  %v21_v2 = vld [vmem:[%s1093_s1 + $0x8] sm:$0xff] }
   0x2   :  { %48 = vmatpush.msra.mxu0 %v23_v0 }
   0x3   :  { %9 = vsyncpa [#allocation3], 0  ;;  %v20_v3 = vld [vmem:[%s1093_s1] sm:$0xff]  ;;  %vm29_vm0 = vcmask 261120   ;;  %s898_s25 = smov 120   ;;  %s899_s26 = smov 96  }
   0x4   :  { %49 = vmatpush.msra.mxu0 %v22_v1  ;;  %v18_v4 = vld [vmem:[%s1092_s0] sm:$0xff]  ;;  %s900_s27 = smov 88   ;;  %v19_v6 = vld [vmem:[%s1092_s0 + $0x8] sm:$0xff]  ;;  %vm62_vm1 = vcmask 64512   ;;  %s901_s0 = smov 112   ;;  %v26_v54 = vld [vmem:[%s1094_s2 + $0x10] sm:$0xff] }
   0x5   :  { %s902_s29 = smov 72   ;;  %s903_s30 = smov 64   ;;  %v24_v37 = vld [vmem:[%s1094_s2] sm:$0xff]  ;;  %v25_v38 = vld [vmem:[%s1094_s2 + $0x8] sm:$0xff] }
   0x6   :  { %50 = vmatpush.msra.mxu0 %v21_v2  ;;  %s904_s5 = smov 56   ;;  %s905_s6 = smov 80  }
   0x7   :  { %s906_s11 = smov 48   ;;  %s907_s12 = smov 104  }
   0x8   :  { %51 = vmatpush.msra.mxu0 %v20_v3  ;;  %s908_s15 = smov 40   ;;  %s779_s22 = sshll.u32 %s1096_s4, 4  ;;  %s780_s22 = int_to_ptr.hbm [resolvable:$true] %s779_s22 }
   0x9   :  { %791 = vmatmul.msk.f32.vlgmr.msra.gmra.mxu0 %vm29_vm0, %v18_v4  ;;  %s910_s23 = smov 128   ;;  %s911_s24 = smov 8  }
  0x11   :  { %792 = vmatmul.msk.f32.gmra.mxu0 %vm29_vm0, %v19_v6 }
  0x86   :  { %v953_v5 = vpop.f32.mrf.mxu0 }
  0x87   :  { %124 = vrot.lane.b32.xlu1 %v953_v5, %s898_s25  ;;  %60 = vrot.lane.b32.xlu0 %v953_v5, %s899_s26 }
  0x8e   :  { %v973_v14 = vpop.f32.mrf.mxu0 }
  0x8f   :  { %126 = vrot.lane.b32.xlu0 %v953_v5, %s900_s27 }
  0xf9   :  { %v61_v7 = vpop.permute.xlu0 %60  ;;  %v125_v9 = vpop.permute.xlu1 %124 }
  0xfa   :  { %793 = vmatpush.xpose.msk.msra.mxu1 %vm62_vm1, %v61_v7 }
  0xfd   :  { %794 = vmatmul.msk.f32.vlgmr.msra.gmra.mxu1 %vm62_vm1, %v953_v5 }
  0xfe   :  { %207 = vmatpush.msrb.mxu1 %v25_v38 }
 0x101   :  { %v127_v8 = vpop.permute.xlu0 %126 }
 0x102   :  { %796 = vmatpush.xpose.msk.msra.mxu3 %vm62_vm1, %v127_v8 }
 0x105   :  { %797 = vmatmul.msk.f32.vlgmr.msra.gmra.mxu3 %vm62_vm1, %v125_v9 }
 0x106   :  { %230 = vmatpush.msrb.mxu3 %v24_v37 }
 0x108   :  { %318 = vmatpush.msra.mxu3 %v26_v54 }
 0x17a   :  { %v84_v10 = vpop.f32.mrf.mxu1 }
 0x17b   :  { %v87_v11 = vsel %vm62_vm1, %v84_v10, -inf }
 0x17c   :  { %88 = vmax.xlane.f32.xlu1 %v87_v11 }
 0x188   :  { %v149_v12 = vpop.f32.mrf.mxu3 }
 0x189   :  { %v152_v13 = vsel %vm62_vm1, %v149_v12, -inf }
 0x18a   :  { %153 = vmax.xlane.f32.xlu2 %v152_v13 }
 0x195   :  { %235 = vrot.lane.b32.xlu1 %v953_v5, %s901_s0 }
 0x19d   :  { %419 = vrot.lane.b32.xlu1 %v973_v14, %s899_s26 }
 0x1a5   :  { %326 = vrot.lane.b32.xlu1 %v953_v5, %s902_s29 }
 0x1ef   :  { %v89_v15 = vpop.xlane.xlu1 %88 }
 0x1f0   :  { %v90_v16 = vsub.f32 %v84_v10, %v89_v15 }
 0x1f2   :  { %v91_v17 = vmul.f32 1.442695, %v90_v16 }
 0x1f4   :  { %840 = vpow2.f32 %v91_v17 }
 0x1fa   :  { %v841_v18 = vpop.eup %840 }
 0x1fb   :  { %v93_v19 = vsel %vm62_vm1, %v841_v18, 0.0 }
 0x1fc   :  { %94 = vadd.xlane.f32.xlu2 %v93_v19 }
 0x1fd   :  { %v154_v20 = vpop.xlane.xlu2 %153 }
 0x1fe   :  { %v155_v21 = vsub.f32 %v149_v12, %v154_v20 }
 0x200   :  { %v156_v22 = vmul.f32 1.442695, %v155_v21 }
 0x202   :  { %842 = vpow2.f32 %v156_v22  ;;  %v27_v22 = vld [vmem:[%s1094_s2 + $0x18] sm:$0xff] }
 0x207   :  { %v236_v23 = vpop.permute.xlu1 %235 }
 0x208   :  { %v843_v24 = vpop.eup %842 }
 0x209   :  { %v158_v25 = vsel %vm62_vm1, %v843_v24, 0.0 }
 0x20a   :  { %159 = vadd.xlane.f32.xlu0 %v158_v25 }
 0x20f   :  { %v980_v26 = vpop.permute.xlu1 %419 }
 0x214   :  { %98 = vrot.lane.b32.xlu2 %v953_v5, %s903_s30 }
 0x217   :  { %v327_v27 = vpop.permute.xlu1 %326 }
 0x218   :  { %805 = vmatpush.xpose.msk.msrb.mxu0 %vm62_vm1, %v327_v27 }
 0x21c   :  { %163 = vrot.lane.b32.xlu2 %v953_v5, %s904_s5 }
 0x224   :  { %237 = vrot.lane.b32.xlu2 %v953_v5, %s905_s6 }
 0x26f   :  { %v95_v28 = vpop.xlane.xlu2 %94 }
 0x270   :  { %844 = vrcp.f32 %v95_v28 }
 0x276   :  { %v845_v29 = vpop.eup %844 }
 0x277   :  { %v99_v30 = vpop.permute.xlu2 %98  ;;  %v97_v31 = vmul.f32 %v845_v29, %v841_v18 }
 0x278   :  { %119 = vmatpush.msra.mxu2 %v99_v30 }
 0x279   :  { %795 = vmatmul.msk.f32.vlgmr.msra.gmra.mxu2 %vm62_vm1, %v97_v31 }
 0x27d   :  { %v160_v32 = vpop.xlane.xlu0 %159 }
 0x27e   :  { %846 = vrcp.f32 %v160_v32 }
 0x27f   :  { %v164_v33 = vpop.permute.xlu2 %163 }
 0x280   :  { %184 = vmatpush.msrb.mxu2 %v164_v33 }
 0x284   :  { %v847_v34 = vpop.eup %846 }
 0x285   :  { %v162_v35 = vmul.f32 %v847_v34, %v843_v24 }
 0x287   :  { %798 = vmatmul.msk.f32.vlgmr.msrb.gmra.mxu2 %vm62_vm1, %v162_v35  ;;  %v238_v36 = vpop.permute.xlu2 %237 }
 0x288   :  { %801 = vmatpush.xpose.msk.msra.mxu2 %vm62_vm1, %v238_v36  ;;  %v1067_v36 = vld [vmem:[%s1095_s3] ss:$0 sm:$0xff]  ;;  %s909_s3 = smov [#allocation2]  }
 0x289   :  { %s777_s19 = sshll.u32 %s909_s3, 4  ;;  %s778_s19 = int_to_ptr.vmem [resolvable:$true] %s777_s19 }
 0x28f   :  { %802 = vmatmul.msk.f32.vlgmr.msra.gmra.mxu2 %vm62_vm1, %v236_v23 }
 0x2fc   :  { %v121_v39 = vpop.f32.mrf.mxu2 }
 0x2fd   :  { %800 = vmatmul.msk.f32.vlgmr.msrb.gmra.mxu3 %vm62_vm1, %v121_v39 }
 0x2fe   :  { %809 = vmatpush.xpose.msk.msrb.mxu3 %vm62_vm1, %v980_v26 }
 0x30a   :  { %v186_v40 = vpop.f32.mrf.mxu2 }
 0x30b   :  { %799 = vmatmul.msk.f32.vlgmr.msrb.gmra.mxu1 %vm62_vm1, %v186_v40 }
 0x312   :  { %v260_v41 = vpop.f32.mrf.mxu2 }
 0x313   :  { %v263_v42 = vsel %vm62_vm1, %v260_v41, -inf }
 0x314   :  { %264 = vmax.xlane.f32.xlu2 %v263_v42 }
 0x32c   :  { %456 = vrot.lane.b32.xlu2 %v973_v14, %s903_s30 }
 0x380   :  { %v1024_v59 = vpop.f32.mrf.mxu3 }
 0x387   :  { %v265_v43 = vpop.xlane.xlu2 %264 }
 0x388   :  { %v266_v44 = vsub.f32 %v260_v41, %v265_v43  ;;  %v1016_v55 = vpop.f32.mrf.mxu1 }
 0x389   :  { %v233_v33 = vadd.f32 %v1024_v59, %v1016_v55 }
 0x38a   :  { %v267_v45 = vmul.f32 1.442695, %v266_v44 }
 0x38c   :  { %848 = vpow2.f32 %v267_v45 }
 0x38f   :  { %v457_v48 = vpop.permute.xlu2 %456 }
 0x390   :  { %477 = vmatpush.msra.mxu0 %v457_v48 }
 0x392   :  { %v849_v46 = vpop.eup %848 }
 0x393   :  { %v269_v47 = vsel %vm62_vm1, %v849_v46, 0.0 }
 0x394   :  { %270 = vadd.xlane.f32.xlu0 %v269_v47 }
 0x3a8   :  { %274 = vrot.lane.b32.xlu0 %v953_v5, %s906_s11 }
 0x3b0   :  { %324 = vrot.lane.b32.xlu0 %v953_v5, %s907_s12 }
 0x407   :  { %v271_v49 = vpop.xlane.xlu0 %270 }
 0x408   :  { %850 = vrcp.f32 %v271_v49 }
 0x40e   :  { %v851_v50 = vpop.eup %850 }
 0x40f   :  { %v273_v51 = vmul.f32 %v851_v50, %v849_v46 }
 0x41a   :  { %v275_v52 = vpop.permute.xlu0 %274 }
 0x41b   :  { %295 = vmatpush.msra.mxu1 %v275_v52 }
 0x41c   :  { %803 = vmatmul.msk.f32.vlgmr.msra.gmra.mxu1 %vm62_vm1, %v273_v51 }
 0x41d   :  { %407 = vmatpush.msrb.mxu1 %v27_v22 }
 0x422   :  { %v325_v53 = vpop.permute.xlu0 %324 }
 0x423   :  { %806 = vmatmul.msk.f32.vlgmr.msrb.gmra.mxu0 %vm62_vm1, %v325_v53 }
 0x424   :  { %588 = vmatpush.msrb.mxu0 %v24_v37 }
 0x499   :  { %v297_v56 = vpop.f32.mrf.mxu1 }
 0x49a   :  { %804 = vmatmul.msk.f32.vlgmr.msra.gmra.mxu3 %vm62_vm1, %v297_v56 }
 0x49b   :  { %565 = vmatpush.msra.mxu3 %v25_v38 }
 0x4a0   :  { %v349_v57 = vpop.f32.mrf.mxu0 }
 0x4a1   :  { %v352_v58 = vsel %vm62_vm1, %v349_v57, -inf }
 0x4a2   :  { %810 = vmatmul.msk.f32.vlgmr.msrb.gmra.mxu3 %vm62_vm1, %v973_v14  ;;  %353 = vmax.xlane.f32.xlu2 %v352_v58 }
 0x4a3   :  { %676 = vmatpush.msrb.mxu3 %v26_v54 }
 0x4ba   :  { %595 = vrot.lane.b32.xlu2 %v973_v14, %s905_s6 }
 0x515   :  { %v354_v60 = vpop.xlane.xlu2 %353 }
 0x516   :  { %v355_v61 = vsub.f32 %v349_v57, %v354_v60 }
 0x518   :  { %v356_v63 = vmul.f32 1.442695, %v355_v61 }
 0x51a   :  { %852 = vpow2.f32 %v356_v63 }
 0x51d   :  { %v1026_v62 = vpop.f32.mrf.mxu3  ;;  %v596_v19 = vpop.permute.xlu2 %595 }
 0x51e   :  { %v323_v34 = vadd.f32 %v1026_v62, %v233_v33 }
 0x520   :  { %v853_v2 = vpop.eup %852 }
 0x521   :  { %v358_v3 = vsel %vm62_vm1, %v853_v2, 0.0 }
 0x525   :  { %v442_v0 = vpop.f32.mrf.mxu3 }
 0x526   :  { %v445_v1 = vsel %vm62_vm1, %v442_v0, -inf }
 0x527   :  { %446 = vmax.xlane.f32.xlu1 %v445_v1 }
 0x52f   :  { %359 = vadd.xlane.f32.xlu1 %v358_v3 }
 0x548   :  { %484 = vrot.lane.b32.xlu1 %v973_v14, %s900_s27 }
 0x550   :  { %684 = vrot.lane.b32.xlu1 %v973_v14, %s902_s29 }
 0x59a   :  { %v447_v4 = vpop.xlane.xlu1 %446 }
 0x59b   :  { %v448_v6 = vsub.f32 %v442_v0, %v447_v4 }
 0x59d   :  { %v449_v7 = vmul.f32 1.442695, %v448_v6 }
 0x59f   :  { %854 = vpow2.f32 %v449_v7 }
 0x5a2   :  { %v360_v10 = vpop.xlane.xlu1 %359 }
 0x5a5   :  { %v855_v8 = vpop.eup %854 }
 0x5a6   :  { %v451_v9 = vsel %vm62_vm1, %v855_v8, 0.0 }
 0x5a7   :  { %452 = vadd.xlane.f32.xlu0 %v451_v9 }
 0x5ba   :  { %v485_v11 = vpop.permute.xlu1 %484 }
 0x5bb   :  { %363 = vrot.lane.b32.xlu0 %v953_v5, %s908_s15 }
 0x5c2   :  { %v685_v16 = vpop.permute.xlu1 %684 }
 0x5c3   :  { %482 = vrot.lane.b32.xlu0 %v973_v14, %s898_s25 }
 0x5cb   :  { %593 = vrot.lane.b32.xlu0 %v973_v14, %s901_s0 }
 0x5d3   :  { %682 = vrot.lane.b32.xlu0 %v973_v14, %s907_s12 }
 0x61a   :  { %v453_v12 = vpop.xlane.xlu0 %452 }
 0x61b   :  { %856 = vrcp.f32 %v453_v12 }
 0x61c   :  { %858 = vrcp.f32 %v360_v10 }
 0x621   :  { %v857_v13 = vpop.eup %856 }
 0x622   :  { %v455_v15 = vmul.f32 %v857_v13, %v855_v8  ;;  %v859_v5 = vpop.eup %858 }
 0x623   :  { %v362_v17 = vmul.f32 %v859_v5, %v853_v2 }
 0x624   :  { %811 = vmatmul.msk.f32.vlgmr.msra.gmra.mxu0 %vm62_vm1, %v455_v15 }
 0x625   :  { %821 = vmatpush.xpose.msk.msra.mxu0 %vm62_vm1, %v685_v16 }
 0x62d   :  { %v364_v18 = vpop.permute.xlu0 %363 }
 0x62e   :  { %384 = vmatpush.msrb.mxu2 %v364_v18 }
 0x62f   :  { %807 = vmatmul.msk.f32.vlgmr.msrb.gmra.mxu2 %vm62_vm1, %v362_v17 }
 0x630   :  { %812 = vmatpush.xpose.msk.msra.mxu2 %vm62_vm1, %v485_v11 }
 0x634   :  { %817 = vmatpush.xpose.msk.msrb.mxu2 %vm62_vm1, %v596_v19 }
 0x635   :  { %v483_v20 = vpop.permute.xlu0 %482 }
 0x637   :  { %813 = vmatmul.msk.f32.vlgmr.msra.gmra.mxu2 %vm62_vm1, %v483_v20 }
 0x63d   :  { %v594_v21 = vpop.permute.xlu0 %593 }
 0x63f   :  { %818 = vmatmul.msk.f32.vlgmr.msrb.gmra.mxu2 %vm62_vm1, %v594_v21 }
 0x645   :  { %v683_v24 = vpop.permute.xlu0 %682 }
 0x6a1   :  { %v479_v23 = vpop.f32.mrf.mxu0 }
 0x6a2   :  { %816 = vmatmul.msk.f32.vlgmr.msrb.gmra.mxu0 %vm62_vm1, %v479_v23 }
 0x6aa   :  { %822 = vmatmul.msk.f32.vlgmr.msra.gmra.mxu0 %vm62_vm1, %v683_v24 }
 0x6b2   :  { %v386_v25 = vpop.f32.mrf.mxu2 }
 0x6b3   :  { %808 = vmatmul.msk.f32.vlgmr.msrb.gmra.mxu1 %vm62_vm1, %v386_v25 }
 0x6ba   :  { %v507_v26 = vpop.f32.mrf.mxu2 }
 0x6bb   :  { %v510_v27 = vsel %vm62_vm1, %v507_v26, -inf }
 0x6bc   :  { %511 = vmax.xlane.f32.xlu1 %v510_v27 }
 0x6c2   :  { %v618_v28 = vpop.f32.mrf.mxu2 }
 0x6c3   :  { %v621_v29 = vsel %vm62_vm1, %v618_v28, -inf }
 0x6c4   :  { %622 = vmax.xlane.f32.xlu0 %v621_v29 }
 0x71f   :  { %v1058_v30 = vpop.f32.mrf.mxu0 }
 0x727   :  { %v707_v31 = vpop.f32.mrf.mxu0 }
 0x728   :  { %v710_v32 = vsel %vm62_vm1, %v707_v31, -inf }
 0x729   :  { %711 = vmax.xlane.f32.xlu2 %v710_v32 }
 0x72f   :  { %v512_v35 = vpop.xlane.xlu1 %511 }
 0x730   :  { %v513_v37 = vsub.f32 %v507_v26, %v512_v35  ;;  %v409_v38 = vpop.f32.mrf.mxu1 }
 0x731   :  { %v412_v39 = vadd.f32 %v409_v38, %v323_v34 }
 0x732   :  { %v514_v40 = vmul.f32 1.442695, %v513_v37 }
 0x733   :  { %v416_v41 = vadd.f32 %v1067_v36, %v412_v39 }
 0x734   :  { %860 = vpow2.f32 %v514_v40 }
 0x735   :  { %417 = vst.msk [vmem:[#allocation2] sm:$0xff] %vm29_vm0, %v416_v41 }
 0x737   :  { %v623_v42 = vpop.xlane.xlu0 %622 }
 0x738   :  { %v624_v43 = vsub.f32 %v618_v28, %v623_v42 }
 0x73a   :  { %v861_v44 = vpop.eup %860  ;;  %v625_v45 = vmul.f32 1.442695, %v624_v43 }
 0x73b   :  { %v516_v46 = vsel %vm62_vm1, %v861_v44, 0.0 }
 0x73c   :  { %862 = vpow2.f32 %v625_v45  ;;  %517 = vadd.xlane.f32.xlu1 %v516_v46 }
 0x742   :  { %v863_v47 = vpop.eup %862 }
 0x743   :  { %v627_v48 = vsel %vm62_vm1, %v863_v47, 0.0 }
 0x744   :  { %628 = vadd.xlane.f32.xlu0 %v627_v48 }
 0x755   :  { %521 = vrot.lane.b32.xlu1 %v973_v14, %s904_s5 }
 0x758   :  { %632 = vrot.lane.b32.xlu0 %v973_v14, %s906_s11 }
 0x79c   :  { %v712_v49 = vpop.xlane.xlu2 %711 }
 0x79d   :  { %v713_v50 = vsub.f32 %v707_v31, %v712_v49 }
 0x79f   :  { %v714_v51 = vmul.f32 1.442695, %v713_v50 }
 0x7a1   :  { %864 = vpow2.f32 %v714_v51 }
 0x7a7   :  { %v865_v52 = vpop.eup %864 }
 0x7a8   :  { %v716_v53 = vsel %vm62_vm1, %v865_v52, 0.0 }
 0x7a9   :  { %717 = vadd.xlane.f32.xlu2 %v716_v53 }
 0x7af   :  { %v518_v54 = vpop.xlane.xlu1 %517 }
 0x7b0   :  { %866 = vrcp.f32 %v518_v54 }
 0x7b6   :  { %v867_v56 = vpop.eup %866 }
 0x7b7   :  { %v629_v55 = vpop.xlane.xlu0 %628  ;;  %v520_v57 = vmul.f32 %v867_v56, %v861_v44 }
 0x7b8   :  { %868 = vrcp.f32 %v629_v55 }
 0x7be   :  { %v869_v60 = vpop.eup %868 }
 0x7bf   :  { %v631_v61 = vmul.f32 %v869_v60, %v863_v47 }
 0x7c1   :  { %721 = vrot.lane.b32.xlu2 %v973_v14, %s908_s15 }
 0x7c7   :  { %v522_v58 = vpop.permute.xlu1 %521 }
 0x7c8   :  { %542 = vmatpush.msra.mxu1 %v522_v58 }
 0x7c9   :  { %814 = vmatmul.msk.f32.vlgmr.msra.gmra.mxu1 %vm62_vm1, %v520_v57 }
 0x7ca   :  { %v633_v59 = vpop.permute.xlu0 %632 }
 0x7cb   :  { %653 = vmatpush.msrb.mxu1 %v633_v59 }
 0x7cd   :  { %765 = vmatpush.msra.mxu1 %v27_v22 }
 0x7d1   :  { %819 = vmatmul.msk.f32.vlgmr.msrb.gmra.mxu1 %vm62_vm1, %v631_v61 }
 0x81c   :  { %v718_v62 = vpop.xlane.xlu2 %717 }
 0x81d   :  { %870 = vrcp.f32 %v718_v62 }
 0x823   :  { %v871_v63 = vpop.eup %870 }
 0x824   :  { %v720_v0 = vmul.f32 %v871_v63, %v865_v52  ;;  %v722_v14 = vpop.permute.xlu2 %721 }
 0x825   :  { %742 = vmatpush.msra.mxu2 %v722_v14 }
 0x826   :  { %823 = vmatmul.msk.f32.vlgmr.msra.gmra.mxu2 %vm62_vm1, %v720_v0 }
 0x846   :  { %v544_v1 = vpop.f32.mrf.mxu1 }
 0x847   :  { %815 = vmatmul.msk.f32.vlgmr.msra.gmra.mxu3 %vm62_vm1, %v544_v1 }
 0x84e   :  { %v655_v2 = vpop.f32.mrf.mxu1 }
 0x84f   :  { %820 = vmatmul.msk.f32.vlgmr.msrb.gmra.mxu3 %vm62_vm1, %v655_v2 }
 0x8a9   :  { %v744_v3 = vpop.f32.mrf.mxu2 }
 0x8aa   :  { %824 = vmatmul.msk.f32.vlgmr.msra.gmra.mxu1 %vm62_vm1, %v744_v3 }
 0x8ca   :  { %v567_v4 = vpop.f32.mrf.mxu3 }
 0x8cb   :  { %v591_v7 = vadd.f32 %v1058_v30, %v567_v4 }
 0x8d2   :  { %v678_v6 = vpop.f32.mrf.mxu3 }
 0x8d3   :  { %v681_v8 = vadd.f32 %v678_v6, %v591_v7 }
 0x927   :  { %v767_v9 = vpop.f32.mrf.mxu1 }
 0x928   :  { %v770_v10 = vadd.f32 %v767_v9, %v681_v8 }
 0x92a   :  { %v771_v11 = vadd.f32 %v1067_v36, %v770_v10 }
 0x92c   :  { %772 = vst.msk [vmem:[#allocation2 + $0x8] sm:$0xff] %vm29_vm0, %v771_v11 }
 0x92d   :  { %785 = dma.vmem_to_hbm [thread:$0]  %s778_s19, 256, %s780_s22, [#allocation3], %s910_s23, %s910_s23, %s911_s24  }
 0x92e   :  { %896 = dma.done.wait [#allocation3], 256  }
 0x92f   :  { %897 = vsyncadd [#allocation3], 4294967040 }
 0x930   :  { %790 = vsyncpa [#allocation3], 1 }

</bundles_post_ra>
